<compile_context>
chip_gen: v6e
topology: v6e:2x2x1
jax: 0.10.0
libtpu: 0.0.40
codegen_flags: <defaults>
</compile_context>

<pallas_src>
import functools

import jax
import jax.numpy as jnp
from jax import lax
from jax.experimental import pallas as pl
from jax.experimental.pallas import tpu as pltpu

EPS = 1e-5          # nn.BatchNorm2d default eps
NEG_SLOPE = 0.01    # F.leaky_relu default negative_slope


def _round_up(x, m):
    return (x + m - 1) // m * m


# ---------------------------------------------------------------------------
# Kernel 1: conv-as-matmul (transposed, lane-dense) + BN statistics.
#   - bf16 x bf16 -> f32 on the MXU
#   - per-channel sum / sum-of-squares accumulated across the "arbitrary" M
#     axis (output-resident, pl.when init); stats are computed from the f32
#     matmul result, only the stored activations are rounded to bf16.
# ---------------------------------------------------------------------------
def conv_stats_kernel(w_ref, p_ref, y_ref, sum_ref, ssq_ref):
    @pl.when(pl.program_id(0) == 0)
    def _init():
        sum_ref[...] = jnp.zeros_like(sum_ref)
        ssq_ref[...] = jnp.zeros_like(ssq_ref)

    y = jnp.dot(w_ref[...], p_ref[...], preferred_element_type=jnp.float32)
    y_ref[...] = y.astype(y_ref.dtype)                 # bf16 intermediate
    # Zero-padded M columns / K rows contribute 0, so stats stay exact.
    sum_ref[...] += jnp.sum(y, axis=1, keepdims=True)
    ssq_ref[...] += jnp.sum(y * y, axis=1, keepdims=True)


# ---------------------------------------------------------------------------
# Kernel 2: BatchNorm (batch stats, biased variance) folded into one FMA,
#           then leaky_relu.  Purely elementwise over wide lane-dense tiles.
#           scale/shift re-derivation is (Cout_p,1) work -> negligible.
# ---------------------------------------------------------------------------
def bn_lrelu_kernel(y_ref, sum_ref, ssq_ref, gamma_ref, beta_ref, o_ref, *, inv_m):
    mean = sum_ref[...] * inv_m                        # (Cout_p, 1)
    var = jnp.maximum(ssq_ref[...] * inv_m - mean * mean, 0.0)
    scale = gamma_ref[...] * lax.rsqrt(var + EPS)
    shift = beta_ref[...] - mean * scale
    z = y_ref[...].astype(jnp.float32) * scale + shift  # single FMA per element
    o_ref[...] = jnp.where(z >= 0, z, NEG_SLOPE * z)


def strided_conv_block(x_nchw, weight, gamma, beta):
    """Forward pass of StridedConvBlock.  x_nchw: (N, Cin, H, W) float32."""
    N, Cin, H, W = x_nchw.shape
    Cout = weight.shape[0]
    KH = KW = 5
    stride, pad = 2, 2
    Ho = (H + 2 * pad - KH) // stride + 1
    Wo = (W + 2 * pad - KW) // stride + 1

    M = N * Ho * Wo
    K = Cin * KH * KW                       # ordered (cin, kh, kw)

    Cout_p = _round_up(Cout, 8)             # sublane-aligned channel dim
    K_p = _round_up(K, 128)                 # lane-dense contraction dim

    # ---- M tile for kernel 1: as large as a conservative VMEM budget allows
    # (per-step double-buffered bytes ~ 4*(K_p+Cout_p)*tm), capped at 8192.
    TM_CAP = 8192
    TM_BUDGET = 24 << 20
    tm = TM_BUDGET // (4 * (K_p + Cout_p))
    tm = max(128, min(TM_CAP, tm, _round_up(M, 128)))
    tm = (tm // 128) * 128
    M_p = _round_up(M, tm)
    n_m = M_p // tm

    # ---- kernel 2 processes km kernel-1 tiles per step (km | n_m) so its
    # per-step HBM bytes are not step-overhead dominated.
    per_tile2 = Cout_p * tm * (2 + 4) * 2   # bf16 in + f32 out, double-buffered
    km_max = max(1, (24 << 20) // per_tile2)
    km = 1
    for d in range(min(km_max, n_m), 0, -1):
        if n_m % d == 0:
            km = d
            break
    tm2 = tm * km
    n_m2 = n_m // km

    # ---- glue: bf16 im2col built directly in (K, M) order (layout plumbing
    # only; minor (Ho, Wo) dims stay in place through the transpose).
    xb = x_nchw.astype(jnp.bfloat16)
    xp = jnp.pad(xb, ((0, 0), (0, 0), (pad, pad), (pad, pad)))
    taps = [xp[:, :, kh:kh + stride * Ho:stride, kw:kw + stride * Wo:stride]
            for kh in range(KH) for kw in range(KW)]          # each (N,Cin,Ho,Wo)
    patches_t = jnp.stack(taps, axis=0)                        # (25,N,Cin,Ho,Wo)
    patches_t = jnp.transpose(patches_t, (2, 0, 1, 3, 4))      # (Cin,25,N,Ho,Wo)
    patches_t = patches_t.reshape(K, M)                        # (K, M) bf16
    patches_t = jnp.pad(patches_t, ((0, K_p - K), (0, M_p - M)))

    # PyTorch OIHW weight flattens straight to (Cout, K) with K=(cin,kh,kw).
    w_t = weight.astype(jnp.bfloat16).reshape(Cout, K)
    w_t = jnp.pad(w_t, ((0, Cout_p - Cout), (0, K_p - K)))     # (Cout_p, K_p)

    gamma_c = jnp.pad(gamma.astype(jnp.float32), (0, Cout_p - Cout)).reshape(Cout_p, 1)
    beta_c = jnp.pad(beta.astype(jnp.float32), (0, Cout_p - Cout)).reshape(Cout_p, 1)

    # ---- kernel 1: tiled matmul + BN sum / sumsq accumulation ----
    k1_vmem = (2 * (K_p * tm * 2 + Cout_p * tm * 2)      # patches + y tiles, 2x buffered
               + 2 * Cout_p * K_p * 2                     # resident weights
               + 8 * Cout_p * 4)                          # stats
    vmem1 = int(min(max(1.5 * k1_vmem + (4 << 20), 32 << 20), 60 << 20))
    bytes_accessed = (w_t.size * 2 + patches_t.size * 2
                      + Cout_p * M_p * 2 + 2 * Cout_p * 4)
    y_t, y_sum, y_ssq = pl.pallas_call(
        conv_stats_kernel,
        out_shape=(
            jax.ShapeDtypeStruct((Cout_p, M_p), jnp.bfloat16),
            jax.ShapeDtypeStruct((Cout_p, 1), jnp.float32),
            jax.ShapeDtypeStruct((Cout_p, 1), jnp.float32),
        ),
        grid=(n_m,),
        in_specs=[
            pl.BlockSpec((Cout_p, K_p), lambda i: (0, 0)),     # weights stay resident
            pl.BlockSpec((K_p, tm), lambda i: (0, i)),
        ],
        out_specs=(
            pl.BlockSpec((Cout_p, tm), lambda i: (0, i)),
            pl.BlockSpec((Cout_p, 1), lambda i: (0, 0)),       # resident accumulators
            pl.BlockSpec((Cout_p, 1), lambda i: (0, 0)),
        ),
        compiler_params=pltpu.CompilerParams(
            dimension_semantics=("arbitrary",),    # M is a reduction axis for the stats
            vmem_limit_bytes=vmem1),
        cost_estimate=pl.CostEstimate(
            flops=2 * Cout_p * K_p * M_p,
            transcendentals=0,
            bytes_accessed=bytes_accessed),
    )(w_t, patches_t)

    # ---- kernel 2: lane-dense BN (folded FMA) + leaky_relu, wide tiles ----
    k2_vmem = 2 * (Cout_p * tm2 * 2 + Cout_p * tm2 * 4) + 8 * Cout_p * 4
    vmem2 = int(min(max(1.5 * k2_vmem + (4 << 20), 32 << 20), 60 << 20))
    out_t = pl.pallas_call(
        functools.partial(bn_lrelu_kernel, inv_m=1.0 / M),
        out_shape=jax.ShapeDtypeStruct((Cout_p, M_p), jnp.float32),
        grid=(n_m2,),
        in_specs=[
            pl.BlockSpec((Cout_p, tm2), lambda i: (0, i)),
            pl.BlockSpec((Cout_p, 1), lambda i: (0, 0)),
            pl.BlockSpec((Cout_p, 1), lambda i: (0, 0)),
            pl.BlockSpec((Cout_p, 1), lambda i: (0, 0)),
            pl.BlockSpec((Cout_p, 1), lambda i: (0, 0)),
        ],
        out_specs=pl.BlockSpec((Cout_p, tm2), lambda i: (0, i)),
        compiler_params=pltpu.CompilerParams(
            dimension_semantics=("parallel",),
            vmem_limit_bytes=vmem2),
    )(y_t, y_sum, y_ssq, gamma_c, beta_c)

    # back to PyTorch NCHW output layout (kept for spec fidelity; downstream
    # consumers that accept channels-first-of-flattened-M could take out_t).
    out = out_t[:Cout, :M].reshape(Cout, N, Ho, Wo)
    return jnp.transpose(out, (1, 0, 2, 3))


def _reference(x_nchw, weight, gamma, beta):
    """Pure-JAX reference mirroring the kernel's precision choices: bf16 conv
    inputs (MXU), f32 accumulation and BN statistics, bf16 rounding of the
    stored pre-BN activations.  PyTorch itself is f32 throughout."""
    xb = x_nchw.astype(jnp.bfloat16).astype(jnp.float32)
    wb = weight.astype(jnp.bfloat16).astype(jnp.float32)
    y = lax.conv_general_dilated(
        xb, wb, window_strides=(2, 2), padding=((2, 2), (2, 2)),
        dimension_numbers=("NCHW", "OIHW", "NCHW"))
    mean = jnp.mean(y, axis=(0, 2, 3), keepdims=True)
    var = jnp.maximum(jnp.mean(y * y, axis=(0, 2, 3), keepdims=True) - mean * mean, 0.0)
    scale = gamma.reshape(1, -1, 1, 1) * lax.rsqrt(var + EPS)
    shift = beta.reshape(1, -1, 1, 1) - mean * scale
    yb = y.astype(jnp.bfloat16).astype(jnp.float32)     # mirror bf16 intermediate
    z = yb * scale + shift
    return jnp.where(z >= 0, z, NEG_SLOPE * z)


if __name__ == "__main__":
    key = jax.random.PRNGKey(0)
    N, Cin, H, W = 2, 4, 16, 16
    Cout = 8

    kx, kw = jax.random.split(key)
    x = jax.random.normal(kx, (N, Cin, H, W), dtype=jnp.float32)
    # deterministic synthetic conv weight (Cout, Cin, 5, 5), no bias
    weight = jax.random.normal(kw, (Cout, Cin, 5, 5), dtype=jnp.float32) * 0.1
    # BatchNorm2d init: weight=1, bias=0
    gamma = jnp.ones((Cout,), dtype=jnp.float32)
    beta = jnp.zeros((Cout,), dtype=jnp.float32)

    out = strided_conv_block(x, weight, gamma, beta)
    out = jax.block_until_ready(out)

    ref = _reference(x, weight, gamma, beta)
    assert out.shape == (N, Cout, H // 2, W // 2), out.shape
    err = float(jnp.max(jnp.abs(out - ref)))
    assert jnp.allclose(out, ref, atol=2e-3, rtol=2e-3), err

    print("KERNEL_OK")
</pallas_src>

<mosaic_0001>
module attributes {stable_mosaic.version = 11 : i64} {
  func.func @conv_stats_kernel(%arg0: i32, %arg1: memref<8x128xbf16, #tpu.memory_space<vmem>>, %arg2: memref<128x128xbf16, #tpu.memory_space<vmem>>, %arg3: memref<8x128xbf16, #tpu.memory_space<vmem>>, %arg4: memref<8x1xf32, #tpu.memory_space<vmem>>, %arg5: memref<8x1xf32, #tpu.memory_space<vmem>>) attributes {dimension_semantics = [#tpu.dimension_semantics<arbitrary>], iteration_bounds = array<i64: 1>, scalar_prefetch = 0 : i64, scratch_operands = 0 : i64, tpu.core_type = #tpu.core_type<tc>, window_params = [{pipeline_mode = #tpu.pipeline_mode<synchronous>, transform_indices = @transform_0, window_bounds = array<i64: 8, 128>}, {transform_indices = @transform_1, window_bounds = array<i64: 128, 128>}, {transform_indices = @transform_2, window_bounds = array<i64: 8, 128>}, {pipeline_mode = #tpu.pipeline_mode<synchronous>, transform_indices = @transform_3, window_bounds = array<i64: 8, 1>}, {pipeline_mode = #tpu.pipeline_mode<synchronous>, transform_indices = @transform_4, window_bounds = array<i64: 8, 1>}]} {
    %c0_i32 = arith.constant 0 : i32
    %0 = arith.cmpi eq, %arg0, %c0_i32 : i32
    %1 = arith.extui %0 : i1 to i32
    %c0_i32_0 = arith.constant 0 : i32
    %2 = arith.cmpi ne, %1, %c0_i32_0 : i32
    scf.if %2 {
      %cst_16 = arith.constant 0.000000e+00 : f32
      %19 = vector.broadcast %cst_16 : f32 to vector<8x1xf32>
      %c0_17 = arith.constant 0 : index
      %c0_18 = arith.constant 0 : index
      %20 = vector.load %arg4[%c0_17, %c0_18] : memref<8x1xf32, #tpu.memory_space<vmem>>, vector<8x1xf32>
      tpu.vector_store %arg4[%c0_17, %c0_18], %19 {strides = array<i32>} : memref<8x1xf32, #tpu.memory_space<vmem>>, vector<8x1xf32>,
      %cst_19 = arith.constant 0.000000e+00 : f32
      %21 = vector.broadcast %cst_19 : f32 to vector<8x1xf32>
      %c0_20 = arith.constant 0 : index
      %c0_21 = arith.constant 0 : index
      %22 = vector.load %arg5[%c0_20, %c0_21] : memref<8x1xf32, #tpu.memory_space<vmem>>, vector<8x1xf32>
      tpu.vector_store %arg5[%c0_20, %c0_21], %21 {strides = array<i32>} : memref<8x1xf32, #tpu.memory_space<vmem>>, vector<8x1xf32>,
    } else {
    }
    %c0 = arith.constant 0 : index
    %c0_1 = arith.constant 0 : index
    %3 = vector.load %arg1[%c0, %c0_1] : memref<8x128xbf16, #tpu.memory_space<vmem>>, vector<8x128xbf16>
    %c0_2 = arith.constant 0 : index
    %c0_3 = arith.constant 0 : index
    %4 = vector.load %arg2[%c0_2, %c0_3] : memref<128x128xbf16, #tpu.memory_space<vmem>>, vector<128x128xbf16>
    %cst = arith.constant dense<0.000000e+00> : vector<8x128xf32>
    %5 = tpu.matmul %3, %4, %cst {dimension_numbers = #tpu.dot_dimension_numbers<[1], [0], [0], [1], [0, 0, 1, 1], [], []>} : vector<8x128xbf16>, vector<128x128xbf16>, vector<8x128xf32> -> vector<8x128xf32>
    %6 = arith.truncf %5 : vector<8x128xf32> to vector<8x128xbf16>
    %c0_4 = arith.constant 0 : index
    %c0_5 = arith.constant 0 : index
    %7 = vector.load %arg3[%c0_4, %c0_5] : memref<8x128xbf16, #tpu.memory_space<vmem>>, vector<8x128xbf16>
    tpu.vector_store %arg3[%c0_4, %c0_5], %6 {strides = array<i32>} : memref<8x128xbf16, #tpu.memory_space<vmem>>, vector<8x128xbf16>,
    %c0_6 = arith.constant 0 : index
    %c0_7 = arith.constant 0 : index
    %8 = vector.load %arg4[%c0_6, %c0_7] : memref<8x1xf32, #tpu.memory_space<vmem>>, vector<8x1xf32>
    %cst_8 = arith.constant dense<0.000000e+00> : vector<8xf32>
    %9 = vector.multi_reduction <add>, %5, %cst_8 [1] : vector<8x128xf32> to vector<8xf32>
    %10 = vector.shape_cast %9 : vector<8xf32> to vector<8x1xf32>
    %11 = arith.addf %8, %10 : vector<8x1xf32>
    %c0_9 = arith.constant 0 : index
    %c0_10 = arith.constant 0 : index
    %12 = vector.load %arg4[%c0_9, %c0_10] : memref<8x1xf32, #tpu.memory_space<vmem>>, vector<8x1xf32>
    tpu.vector_store %arg4[%c0_9, %c0_10], %11 {strides = array<i32>} : memref<8x1xf32, #tpu.memory_space<vmem>>, vector<8x1xf32>,
    %c0_11 = arith.constant 0 : index
    %c0_12 = arith.constant 0 : index
    %13 = vector.load %arg5[%c0_11, %c0_12] : memref<8x1xf32, #tpu.memory_space<vmem>>, vector<8x1xf32>
    %14 = arith.mulf %5, %5 : vector<8x128xf32>
    %cst_13 = arith.constant dense<0.000000e+00> : vector<8xf32>
    %15 = vector.multi_reduction <add>, %14, %cst_13 [1] : vector<8x128xf32> to vector<8xf32>
    %16 = vector.shape_cast %15 : vector<8xf32> to vector<8x1xf32>
    %17 = arith.addf %13, %16 : vector<8x1xf32>
    %c0_14 = arith.constant 0 : index
    %c0_15 = arith.constant 0 : index
    %18 = vector.load %arg5[%c0_14, %c0_15] : memref<8x1xf32, #tpu.memory_space<vmem>>, vector<8x1xf32>
    tpu.vector_store %arg5[%c0_14, %c0_15], %17 {strides = array<i32>} : memref<8x1xf32, #tpu.memory_space<vmem>>, vector<8x1xf32>,
    return
  }
  func.func @transform_0(%arg0: i32) -> (i32, i32) {
    %c0_i32 = arith.constant 0 : i32
    %c0_i32_0 = arith.constant 0 : i32
    %c0_i32_1 = arith.constant 0 : i32
    return %c0_i32, %c0_i32_0 : i32, i32
  }
  func.func @transform_1(%arg0: i32) -> (i32, i32) {
    %c0_i32 = arith.constant 0 : i32
    %c0_i32_0 = arith.constant 0 : i32
    return %c0_i32, %arg0 : i32, i32
  }
  func.func @transform_2(%arg0: i32) -> (i32, i32) {
    %c0_i32 = arith.constant 0 : i32
    %c0_i32_0 = arith.constant 0 : i32
    return %c0_i32, %arg0 : i32, i32
  }
  func.func @transform_3(%arg0: i32) -> (i32, i32) {
    %c0_i32 = arith.constant 0 : i32
    %c0_i32_0 = arith.constant 0 : i32
    %c0_i32_1 = arith.constant 0 : i32
    return %c0_i32, %c0_i32_0 : i32, i32
  }
  func.func @transform_4(%arg0: i32) -> (i32, i32) {
    %c0_i32 = arith.constant 0 : i32
    %c0_i32_0 = arith.constant 0 : i32
    %c0_i32_1 = arith.constant 0 : i32
    return %c0_i32, %c0_i32_0 : i32, i32
  }
}

</mosaic_0001>

<bundles_post_ra>
// kernel: tpu_custom_call.1
= control target key start
LH: loop header
LB: loop body
LE: loop exit
PB: predicated region body
PF: predicated region fallthrough
CT: control target
= control target key end

     0   :  { %10 = vsyncpa [#allocation3], 0  ;;  %s373_s0 = inlined_call_operand.hbm [shape: bf16[8,128], index: 0, kind: input, shape index: {}]   ;;  %s374_s1 = inlined_call_operand.hbm [shape: bf16[128,128], index: 1, kind: input, shape index: {}]   ;;  %s375_s2 = inlined_call_operand.hbm [shape: bf16[8,128], index: 2, kind: output, shape index: {0}]   ;;  %s376_s3 = inlined_call_operand.vmem [shape: f32[8,1], index: 3, kind: output, shape index: {1}]   ;;  %s377_s4 = inlined_call_operand.vmem [shape: f32[8,1], index: 4, kind: output, shape index: {2}]  }
   0x1   :  { %11 = vsyncpa [#allocation6], 0 }
   0x2   :  { %12 = vsyncpa [#allocation4], 0  ;;  %s310_s15 = smov [#allocation2]   ;;  %s311_s17 = smov [#allocation5]  }
   0x3   :  { %s19_s16 = sshll.u32 %s310_s15, 4  ;;  %s28_s18 = sshll.u32 %s311_s17, 4  ;;  %s20_s16 = int_to_ptr.vmem [resolvable:$true] %s19_s16  ;;  %s29_s18 = int_to_ptr.vmem [resolvable:$true] %s28_s18 }
   0x4   :  { %s252_s19 = scalar_lea.vmem %s20_s16, 64  ;;  %p257_p1 = scmp.lt.s32.totalorder %s20_s16, %s20_s16 }
   0x5   :  { %p253_p0 = scmp.ne.s32.totalorder %s20_s16, %s252_s19  ;;  %p258_p2 = scmp.lt.s32.totalorder %s252_s19, %s252_s19 }
   0x7   :  { %p259_p3 = por %p258_p2, %p257_p1 }
   0x9   :  { %p260_p4 = pnand %p259_p3, %p253_p0 }
   0xb   :  { %263 = shalt.err (!%p260_p4)
}
   0xc   :  { %22 = dma.hbm_to_vmem [thread:$0]  %s373_s0, 64, %s20_s16, [#allocation3]  }
   0xd   :  { %s272_s22 = scalar_lea.vmem %s29_s18, 1024  ;;  %p277_p6 = scmp.lt.s32.totalorder %s29_s18, %s29_s18 }
   0xe   :  { %p273_p5 = scmp.ne.s32.totalorder %s29_s18, %s272_s22  ;;  %p278_p7 = scmp.lt.s32.totalorder %s272_s22, %s272_s22 }
  0x10   :  { %p279_p8 = por %p278_p7, %p277_p6 }
  0x12   :  { %p280_p9 = pnand %p279_p8, %p273_p5 }
  0x14   :  { %283 = shalt.err (!%p280_p9)
}
  0x15   :  { %s312_s23 = smov 64   ;;  %s313_s24 = smov 4  }
  0x16   :  { %34 = dma.hbm_to_vmem [thread:$0]  %s374_s1, 1024, %s29_s18, [#allocation6], %s312_s23, %s312_s23, %s313_s24  }
  0x17   :  { %304 = dma.done.wait [#allocation3], 64  }
  0x18   :  { %305 = vsyncadd [#allocation3], 4294967232 }
  0x19   :  { %306 = dma.done.wait [#allocation6], 1024  }
  0x1a   :  { %307 = vsyncadd [#allocation6], 4294966272  ;;  %v314_v0 = vmov 0.0   ;;  %vm315_vm0 = vmmov 0   ;;  %v236_v1 = vld [vmem:[#allocation5 + $0x38] sm:$0xff]   ;;  %v237_v2 = vld [vmem:[#allocation5 + $0x30] sm:$0xff]  }
  0x1b   :  { %209 = vmatprep.subr.bf16.mxu0 %v314_v0  ;;  %225 = vmatprep.mubr.msk.bf16.mxu0 %vm315_vm0, %v314_v0  ;;  %v238_v3 = vld [vmem:[#allocation5 + $0x28] sm:$0xff]   ;;  %v239_v4 = vld [vmem:[#allocation5 + $0x20] sm:$0xff]   ;;  %v240_v5 = vld [vmem:[#allocation5 + $0x18] sm:$0xff]   ;;  %vm46_vm1 = vcmask 7168   ;;  %s316_s29 = smov [#allocation7]  }
  0x1c   :  { %210 = vmatpush3.bf16.msra.mxu0 %v236_v1  ;;  %v241_v6 = vld [vmem:[#allocation5 + $0x10] sm:$0xff]   ;;  %v242_v7 = vld [vmem:[#allocation5 + $0x8] sm:$0xff]   ;;  %v243_v8 = vld [vmem:[#allocation5] sm:$0xff]   ;;  %47 = vst.msk [vmem:[%s376_s3] sm:$0xff] %vm46_vm1, %v314_v0  ;;  %s174_s30 = sshll.u32 %s316_s29, 4  ;;  %s175_s30 = int_to_ptr.vmem [resolvable:$true] %s174_s30 }
  0x1d   :  { %211 = vmatprep.subr.bf16.mxu0 %v314_v0  ;;  %v49_v9 = vld [vmem:[#allocation2] sm:$0xf]  ;;  %48 = vst.msk [vmem:[%s377_s4] sm:$0xff] %vm46_vm1, %v314_v0  ;;  %s284_s5 = scalar_lea.vmem %s175_s30, 64  ;;  %p289_p11 = scmp.lt.s32.totalorder %s175_s30, %s175_s30 }
  0x1e   :  { %p285_p10 = scmp.ne.s32.totalorder %s175_s30, %s284_s5  ;;  %p290_p12 = scmp.lt.s32.totalorder %s284_s5, %s284_s5 }
  0x20   :  { %212 = vmatpush3.bf16.msra.mxu0 %v237_v2  ;;  %p291_p13 = por %p290_p12, %p289_p11 }
  0x21   :  { %213 = vmatprep.subr.bf16.mxu0 %v314_v0 }
  0x22   :  { %p292_p0 = pnand %p291_p13, %p285_p10 }
  0x24   :  { %214 = vmatpush3.bf16.msra.mxu0 %v238_v3 }
  0x25   :  { %215 = vmatprep.subr.bf16.mxu0 %v314_v0 }
  0x28   :  { %216 = vmatpush3.bf16.msra.mxu0 %v239_v4 }
  0x29   :  { %217 = vmatprep.subr.bf16.mxu0 %v314_v0 }
  0x2c   :  { %218 = vmatpush3.bf16.msra.mxu0 %v240_v5 }
  0x2d   :  { %219 = vmatprep.subr.bf16.mxu0 %v314_v0 }
  0x30   :  { %220 = vmatpush3.bf16.msra.mxu0 %v241_v6 }
  0x31   :  { %221 = vmatprep.subr.bf16.mxu0 %v314_v0 }
  0x34   :  { %222 = vmatpush3.bf16.msra.mxu0 %v242_v7 }
  0x35   :  { %223 = vmatprep.subr.bf16.mxu0 %v314_v0 }
  0x38   :  { %224 = vmatpush3.bf16.msra.mxu0 %v243_v8 }
  0x3b   :  { %226 = vmatmul.mubr.bf16.vlgmr.msra.gmra.mxu0 %v49_v9 }
  0xfb   :  { %v148_v10 = vpop.f32.mrf.mxu0 }
  0xfc   :  { %v154_v11 = vpack.c.bf16 %v148_v10, %v148_v10  ;;  %157 = vadd.xlane.f32.xlu0 %v148_v10  ;;  %v163_v13 = vmul.f32 %v148_v10, %v148_v10 }
  0xfd   :  { %v227_v12 = vpop.f32.mrf.mxu0 }
  0xfe   :  { %155 = vst [vmem:[#allocation7] sm:$0xf] %v154_v11 }
  0xff   :  { %v151_v14 = vpop.f32.mrf.mxu0 }
 0x100   :  { %164 = vadd.xlane.f32.xlu0 %v163_v13 }
 0x101   :  { %v228_v15 = vpop.f32.mrf.mxu0 }
 0x102   :  { %295 = shalt.err (!%p292_p0)
}
 0x103   :  { %177 = dma.vmem_to_hbm [thread:$0]  %s175_s30, 64, %s375_s2, [#allocation4]   ;;  %v156_v16 = vld [vmem:[%s376_s3] sm:$0xff] }
 0x104   :  { %v162_v19 = vld [vmem:[%s377_s4] sm:$0xff] }
 0x185   :  { %v158_v17 = vpop.xlane.xlu0 %157 }
 0x186   :  { %v159_v18 = vadd.f32 %v158_v17, %v156_v16 }
 0x188   :  { %161 = vst.msk [vmem:[%s376_s3] sm:$0xff] %vm46_vm1, %v159_v18 }
 0x189   :  { %v165_v20 = vpop.xlane.xlu0 %164 }
 0x18a   :  { %v166_v21 = vadd.f32 %v165_v20, %v162_v19 }
 0x18c   :  { %167 = vst.msk [vmem:[%s377_s4] sm:$0xff] %vm46_vm1, %v166_v21 }
 0x18d   :  { %308 = dma.done.wait [#allocation4], 64  }
 0x18e   :  { %309 = vsyncadd [#allocation4], 4294967232 }
 0x18f   :  { %189 = vsyncpa [#allocation3], 1 }
 0x190   :  { %190 = vsyncpa [#allocation6], 1 }
 0x191   :  { %191 = vsyncpa [#allocation4], 1 }

</bundles_post_ra>
